<compile_context>
chip_gen: v7x
topology: tpu7x:2x2x1
jax: 0.10.0
libtpu: 0.0.40
codegen_flags: <defaults>
</compile_context>

<pallas_src>
import functools

import jax
import jax.numpy as jnp
from jax.experimental import pallas as pl
from jax.experimental.pallas import tpu as pltpu


def _conv3x3_bias_relu_kernel(x_ref, w_ref, b_ref, o_ref, *, H, W, C):
    """One image per grid step.

    x_ref: (C, (H+2)*W + 2)  bf16  H-padded, spatially flattened input with
                                   1-element guards so every (kh, kw) tap is a
                                   contiguous, in-bounds slice of length H*W.
    w_ref: (O, 9*C)          bf16  filter in (kh, kw, c)-minor order.
    b_ref: (O, 1)            f32
    o_ref: (O, H*W)          f32   channel-major, lane-dense output.
    """
    HW = H * W
    O = o_ref.shape[0]

    # column (w) index of every flattened output pixel — used to mask the
    # horizontally shifted taps (kw = 0 / 2), which wrap across row boundaries.
    col = jax.lax.broadcasted_iota(jnp.int32, (1, HW), 1) % W

    acc = jnp.zeros((O, HW), jnp.float32)
    for kh in range(3):
        for kw in range(3):
            # tap[c, h*W + w] == x_pad[c, h + kh, w + kw - 1]
            # (garbage at horizontal edges, masked out below).
            tap = x_ref[:, pl.ds(kh * W + kw, HW)]            # (C, HW) bf16
            wk = w_ref[:, pl.ds((kh * 3 + kw) * C, C)]        # (O, C)  bf16
            part = jnp.dot(wk, tap, preferred_element_type=jnp.float32)
            if kw == 0:                                       # needs w-1 >= 0
                part = jnp.where(col > 0, part, 0.0)
            elif kw == 2:                                     # needs w+1 <= W-1
                part = jnp.where(col < W - 1, part, 0.0)
            acc = acc + part

    acc = acc + b_ref[...]                                    # (O, 1) broadcast
    o_ref[...] = jnp.maximum(acc, 0.0).astype(o_ref.dtype)


def conv_relu_forward(x_nchw, weight, bias, *, compute_dtype=jnp.bfloat16):
    """3x3 conv (stride 1, padding 1) + ReLU with nn.Conv2d semantics.

    x_nchw: (N, C, H, W) float32,  weight: (O, C, 3, 3) OIHW,  bias: (O,)
    returns (N, O, H, W) float32
    """
    N, C, H, W = x_nchw.shape
    O = weight.shape[0]
    HW = H * W
    L = (H + 2) * W + 2

    # --- glue (cheap, fused by XLA): pad H by 1, flatten spatial dims, add a
    #     1-element guard on each end, cast to bf16.  This is the only HBM copy
    #     of the input — the 9x im2col blow-up never touches HBM.
    xp = jnp.pad(x_nchw, ((0, 0), (0, 0), (1, 1), (0, 0)))          # (N, C, H+2, W)
    xflat = jnp.pad(xp.reshape(N, C, (H + 2) * W),
                    ((0, 0), (0, 0), (1, 1))).astype(compute_dtype)  # (N, C, L)

    # weight OIHW -> (O, kh, kw, C) -> (O, 9C), matching the kernel's tap order.
    w2 = jnp.transpose(weight, (0, 2, 3, 1)).reshape(O, 9 * C).astype(compute_dtype)
    b2 = bias.astype(jnp.float32).reshape(O, 1)

    kernel = functools.partial(_conv3x3_bias_relu_kernel, H=H, W=W, C=C)

    # NOTE: one image per grid step keeps the whole padded image in VMEM; for
    # very large H*W this block should be split into halo'd row tiles instead.
    out = pl.pallas_call(
        kernel,
        out_shape=jax.ShapeDtypeStruct((N, O, HW), jnp.float32),
        grid_spec=pltpu.PrefetchScalarGridSpec(
            num_scalar_prefetch=0,
            grid=(N,),
            in_specs=[
                pl.BlockSpec((None, C, L), lambda n: (n, 0, 0)),     # image
                pl.BlockSpec((O, 9 * C), lambda n: (0, 0)),          # weights
                pl.BlockSpec((O, 1), lambda n: (0, 0)),              # bias
            ],
            out_specs=pl.BlockSpec((None, O, HW), lambda n: (n, 0, 0)),
        ),
        compiler_params=pltpu.CompilerParams(
            dimension_semantics=("parallel",)),
    )(xflat, w2, b2)

    # channel-major result reshapes straight to NCHW — no final transpose.
    return out.reshape(N, O, H, W)


if __name__ == "__main__":
    key = jax.random.PRNGKey(0)
    k_x, k_w, k_b = jax.random.split(key, 3)

    # shapes implied by conv_relu(in_=4, out=8) on a 2x4x16x16 input
    N, C_in, C_out, H, W = 2, 4, 8, 16, 16
    x = jax.random.normal(k_x, (N, C_in, H, W), jnp.float32)

    # deterministic nn.Conv2d-style init: U(-1/sqrt(fan_in), 1/sqrt(fan_in))
    fan_in = C_in * 3 * 3
    bound = 1.0 / (fan_in ** 0.5)
    weight = jax.random.uniform(k_w, (C_out, C_in, 3, 3), jnp.float32, -bound, bound)
    bias = jax.random.uniform(k_b, (C_out,), jnp.float32, -bound, bound)

    y = jax.jit(conv_relu_forward)(x, weight, bias)
    y = jax.block_until_ready(y)
    assert y.shape == (N, C_out, H, W)

    # reference: XLA conv with the same bf16 input/weight rounding, f32 accum
    ref = jax.lax.conv_general_dilated(
        x.astype(jnp.bfloat16), weight.astype(jnp.bfloat16),
        window_strides=(1, 1), padding=((1, 1), (1, 1)),
        dimension_numbers=("NCHW", "OIHW", "NCHW"),
        preferred_element_type=jnp.float32)
    ref = jnp.maximum(ref + bias[None, :, None, None], 0.0)
    err = float(jnp.max(jnp.abs(y - ref)))
    assert jnp.allclose(y, ref, atol=2e-2, rtol=2e-2), err

    print("KERNEL_OK")
</pallas_src>

<mosaic_0001>
module attributes {stable_mosaic.version = 11 : i64} {
  func.func @_conv3x3_bias_relu_kernel(%arg0: i32, %arg1: memref<1x4x290xbf16, #tpu.memory_space<vmem>>, %arg2: memref<8x36xbf16, #tpu.memory_space<vmem>>, %arg3: memref<8x1xf32, #tpu.memory_space<vmem>>, %arg4: memref<1x8x256xf32, #tpu.memory_space<vmem>>) attributes {dimension_semantics = [#tpu.dimension_semantics<parallel>], iteration_bounds = array<i64: 2>, scalar_prefetch = 0 : i64, scratch_operands = 0 : i64, tpu.core_type = #tpu.core_type<tc>, window_params = [{transform_indices = @transform_0, window_bounds = array<i64: 1, 4, 290>}, {pipeline_mode = #tpu.pipeline_mode<synchronous>, transform_indices = @transform_1, window_bounds = array<i64: 8, 36>}, {pipeline_mode = #tpu.pipeline_mode<synchronous>, transform_indices = @transform_2, window_bounds = array<i64: 8, 1>}, {transform_indices = @transform_3, window_bounds = array<i64: 1, 8, 256>}]} {
    %0 = tpu.iota {dimensions = array<i32: 1>} : vector<1x256xi32>
    %c16_i32 = arith.constant 16 : i32
    %c0_i32 = arith.constant 0 : i32
    %1 = arith.cmpi eq, %c16_i32, %c0_i32 : i32
    %c1_i32 = arith.constant 1 : i32
    %2 = arith.select %1, %c1_i32, %c16_i32 : i32
    %3 = vector.broadcast %2 : i32 to vector<1x256xi32>
    %4 = arith.remsi %0, %3 : vector<1x256xi32>
    %c0_i32_0 = arith.constant 0 : i32
    %5 = vector.broadcast %c0_i32_0 : i32 to vector<1x256xi32>
    %6 = arith.cmpi ne, %4, %5 : vector<1x256xi32>
    %c0_i32_1 = arith.constant 0 : i32
    %7 = vector.broadcast %c0_i32_1 : i32 to vector<1x256xi32>
    %8 = arith.cmpi slt, %4, %7 : vector<1x256xi32>
    %c0_i32_2 = arith.constant 0 : i32
    %9 = arith.cmpi slt, %2, %c0_i32_2 : i32
    %10 = vector.broadcast %9 : i1 to vector<1x256xi1>
    %11 = vector.broadcast %10 : vector<1x256xi1> to vector<1x256xi1>
    %12 = arith.xori %8, %11 : vector<1x256xi1>
    %13 = arith.andi %12, %6 : vector<1x256xi1>
    %14 = vector.broadcast %2 : i32 to vector<1x256xi32>
    %15 = arith.addi %4, %14 : vector<1x256xi32>
    %16 = arith.select %13, %15, %4 : vector<1x256xi1>, vector<1x256xi32>
    %cst = arith.constant 0.000000e+00 : f32
    %17 = vector.broadcast %cst : f32 to vector<8x256xf32>
    %c0 = arith.constant 0 : index
    %c0_3 = arith.constant 0 : index
    %c0_4 = arith.constant 0 : index
    %18 = vector.load %arg1[%c0, %c0_3, %c0_4] : memref<1x4x290xbf16, #tpu.memory_space<vmem>>, vector<1x4x256xbf16>
    %19 = vector.shape_cast %18 : vector<1x4x256xbf16> to vector<4x256xbf16>
    %c0_5 = arith.constant 0 : index
    %c0_6 = arith.constant 0 : index
    %20 = vector.load %arg2[%c0_5, %c0_6] : memref<8x36xbf16, #tpu.memory_space<vmem>>, vector<8x4xbf16>
    %cst_7 = arith.constant dense<0.000000e+00> : vector<8x256xf32>
    %21 = tpu.matmul %20, %19, %cst_7 {dimension_numbers = #tpu.dot_dimension_numbers<[1], [0], [0], [1], [0, 0, 1, 1], [], []>} : vector<8x4xbf16>, vector<4x256xbf16>, vector<8x256xf32> -> vector<8x256xf32>
    %c0_i32_8 = arith.constant 0 : i32
    %22 = vector.broadcast %c0_i32_8 : i32 to vector<1x256xi32>
    %23 = arith.cmpi sgt, %16, %22 : vector<1x256xi32>
    %cst_9 = arith.constant 0.000000e+00 : f32
    %24 = vector.shape_cast %23 : vector<1x256xi1> to vector<1x256xi1>
    %25 = vector.broadcast %24 : vector<1x256xi1> to vector<8x256xi1>
    %26 = vector.broadcast %cst_9 : f32 to vector<8x256xf32>
    %27 = arith.select %25, %21, %26 : vector<8x256xi1>, vector<8x256xf32>
    %28 = arith.addf %17, %27 : vector<8x256xf32>
    %c0_10 = arith.constant 0 : index
    %c0_11 = arith.constant 0 : index
    %c1 = arith.constant 1 : index
    %29 = vector.load %arg1[%c0_10, %c0_11, %c1] : memref<1x4x290xbf16, #tpu.memory_space<vmem>>, vector<1x4x256xbf16>
    %30 = vector.shape_cast %29 : vector<1x4x256xbf16> to vector<4x256xbf16>
    %c0_12 = arith.constant 0 : index
    %c4 = arith.constant 4 : index
    %31 = vector.load %arg2[%c0_12, %c4] : memref<8x36xbf16, #tpu.memory_space<vmem>>, vector<8x4xbf16>
    %cst_13 = arith.constant dense<0.000000e+00> : vector<8x256xf32>
    %32 = tpu.matmul %31, %30, %cst_13 {dimension_numbers = #tpu.dot_dimension_numbers<[1], [0], [0], [1], [0, 0, 1, 1], [], []>} : vector<8x4xbf16>, vector<4x256xbf16>, vector<8x256xf32> -> vector<8x256xf32>
    %33 = arith.addf %28, %32 : vector<8x256xf32>
    %c0_14 = arith.constant 0 : index
    %c0_15 = arith.constant 0 : index
    %c2 = arith.constant 2 : index
    %34 = vector.load %arg1[%c0_14, %c0_15, %c2] : memref<1x4x290xbf16, #tpu.memory_space<vmem>>, vector<1x4x256xbf16>
    %35 = vector.shape_cast %34 : vector<1x4x256xbf16> to vector<4x256xbf16>
    %c0_16 = arith.constant 0 : index
    %c8 = arith.constant 8 : index
    %36 = vector.load %arg2[%c0_16, %c8] : memref<8x36xbf16, #tpu.memory_space<vmem>>, vector<8x4xbf16>
    %cst_17 = arith.constant dense<0.000000e+00> : vector<8x256xf32>
    %37 = tpu.matmul %36, %35, %cst_17 {dimension_numbers = #tpu.dot_dimension_numbers<[1], [0], [0], [1], [0, 0, 1, 1], [], []>} : vector<8x4xbf16>, vector<4x256xbf16>, vector<8x256xf32> -> vector<8x256xf32>
    %c15_i32 = arith.constant 15 : i32
    %38 = vector.broadcast %c15_i32 : i32 to vector<1x256xi32>
    %39 = arith.cmpi slt, %16, %38 : vector<1x256xi32>
    %cst_18 = arith.constant 0.000000e+00 : f32
    %40 = vector.shape_cast %39 : vector<1x256xi1> to vector<1x256xi1>
    %41 = vector.broadcast %40 : vector<1x256xi1> to vector<8x256xi1>
    %42 = vector.broadcast %cst_18 : f32 to vector<8x256xf32>
    %43 = arith.select %41, %37, %42 : vector<8x256xi1>, vector<8x256xf32>
    %44 = arith.addf %33, %43 : vector<8x256xf32>
    %c0_19 = arith.constant 0 : index
    %c0_20 = arith.constant 0 : index
    %c16 = arith.constant 16 : index
    %45 = vector.load %arg1[%c0_19, %c0_20, %c16] : memref<1x4x290xbf16, #tpu.memory_space<vmem>>, vector<1x4x256xbf16>
    %46 = vector.shape_cast %45 : vector<1x4x256xbf16> to vector<4x256xbf16>
    %c0_21 = arith.constant 0 : index
    %c12 = arith.constant 12 : index
    %47 = vector.load %arg2[%c0_21, %c12] : memref<8x36xbf16, #tpu.memory_space<vmem>>, vector<8x4xbf16>
    %cst_22 = arith.constant dense<0.000000e+00> : vector<8x256xf32>
    %48 = tpu.matmul %47, %46, %cst_22 {dimension_numbers = #tpu.dot_dimension_numbers<[1], [0], [0], [1], [0, 0, 1, 1], [], []>} : vector<8x4xbf16>, vector<4x256xbf16>, vector<8x256xf32> -> vector<8x256xf32>
    %c0_i32_23 = arith.constant 0 : i32
    %49 = vector.broadcast %c0_i32_23 : i32 to vector<1x256xi32>
    %50 = arith.cmpi sgt, %16, %49 : vector<1x256xi32>
    %cst_24 = arith.constant 0.000000e+00 : f32
    %51 = vector.shape_cast %50 : vector<1x256xi1> to vector<1x256xi1>
    %52 = vector.broadcast %51 : vector<1x256xi1> to vector<8x256xi1>
    %53 = vector.broadcast %cst_24 : f32 to vector<8x256xf32>
    %54 = arith.select %52, %48, %53 : vector<8x256xi1>, vector<8x256xf32>
    %55 = arith.addf %44, %54 : vector<8x256xf32>
    %c0_25 = arith.constant 0 : index
    %c0_26 = arith.constant 0 : index
    %c17 = arith.constant 17 : index
    %56 = vector.load %arg1[%c0_25, %c0_26, %c17] : memref<1x4x290xbf16, #tpu.memory_space<vmem>>, vector<1x4x256xbf16>
    %57 = vector.shape_cast %56 : vector<1x4x256xbf16> to vector<4x256xbf16>
    %c0_27 = arith.constant 0 : index
    %c16_28 = arith.constant 16 : index
    %58 = vector.load %arg2[%c0_27, %c16_28] : memref<8x36xbf16, #tpu.memory_space<vmem>>, vector<8x4xbf16>
    %cst_29 = arith.constant dense<0.000000e+00> : vector<8x256xf32>
    %59 = tpu.matmul %58, %57, %cst_29 {dimension_numbers = #tpu.dot_dimension_numbers<[1], [0], [0], [1], [0, 0, 1, 1], [], []>} : vector<8x4xbf16>, vector<4x256xbf16>, vector<8x256xf32> -> vector<8x256xf32>
    %60 = arith.addf %55, %59 : vector<8x256xf32>
    %c0_30 = arith.constant 0 : index
    %c0_31 = arith.constant 0 : index
    %c18 = arith.constant 18 : index
    %61 = vector.load %arg1[%c0_30, %c0_31, %c18] : memref<1x4x290xbf16, #tpu.memory_space<vmem>>, vector<1x4x256xbf16>
    %62 = vector.shape_cast %61 : vector<1x4x256xbf16> to vector<4x256xbf16>
    %c0_32 = arith.constant 0 : index
    %c20 = arith.constant 20 : index
    %63 = vector.load %arg2[%c0_32, %c20] : memref<8x36xbf16, #tpu.memory_space<vmem>>, vector<8x4xbf16>
    %cst_33 = arith.constant dense<0.000000e+00> : vector<8x256xf32>
    %64 = tpu.matmul %63, %62, %cst_33 {dimension_numbers = #tpu.dot_dimension_numbers<[1], [0], [0], [1], [0, 0, 1, 1], [], []>} : vector<8x4xbf16>, vector<4x256xbf16>, vector<8x256xf32> -> vector<8x256xf32>
    %c15_i32_34 = arith.constant 15 : i32
    %65 = vector.broadcast %c15_i32_34 : i32 to vector<1x256xi32>
    %66 = arith.cmpi slt, %16, %65 : vector<1x256xi32>
    %cst_35 = arith.constant 0.000000e+00 : f32
    %67 = vector.shape_cast %66 : vector<1x256xi1> to vector<1x256xi1>
    %68 = vector.broadcast %67 : vector<1x256xi1> to vector<8x256xi1>
    %69 = vector.broadcast %cst_35 : f32 to vector<8x256xf32>
    %70 = arith.select %68, %64, %69 : vector<8x256xi1>, vector<8x256xf32>
    %71 = arith.addf %60, %70 : vector<8x256xf32>
    %c0_36 = arith.constant 0 : index
    %c0_37 = arith.constant 0 : index
    %c32 = arith.constant 32 : index
    %72 = vector.load %arg1[%c0_36, %c0_37, %c32] : memref<1x4x290xbf16, #tpu.memory_space<vmem>>, vector<1x4x256xbf16>
    %73 = vector.shape_cast %72 : vector<1x4x256xbf16> to vector<4x256xbf16>
    %c0_38 = arith.constant 0 : index
    %c24 = arith.constant 24 : index
    %74 = vector.load %arg2[%c0_38, %c24] : memref<8x36xbf16, #tpu.memory_space<vmem>>, vector<8x4xbf16>
    %cst_39 = arith.constant dense<0.000000e+00> : vector<8x256xf32>
    %75 = tpu.matmul %74, %73, %cst_39 {dimension_numbers = #tpu.dot_dimension_numbers<[1], [0], [0], [1], [0, 0, 1, 1], [], []>} : vector<8x4xbf16>, vector<4x256xbf16>, vector<8x256xf32> -> vector<8x256xf32>
    %c0_i32_40 = arith.constant 0 : i32
    %76 = vector.broadcast %c0_i32_40 : i32 to vector<1x256xi32>
    %77 = arith.cmpi sgt, %16, %76 : vector<1x256xi32>
    %cst_41 = arith.constant 0.000000e+00 : f32
    %78 = vector.shape_cast %77 : vector<1x256xi1> to vector<1x256xi1>
    %79 = vector.broadcast %78 : vector<1x256xi1> to vector<8x256xi1>
    %80 = vector.broadcast %cst_41 : f32 to vector<8x256xf32>
    %81 = arith.select %79, %75, %80 : vector<8x256xi1>, vector<8x256xf32>
    %82 = arith.addf %71, %81 : vector<8x256xf32>
    %c0_42 = arith.constant 0 : index
    %c0_43 = arith.constant 0 : index
    %c33 = arith.constant 33 : index
    %83 = vector.load %arg1[%c0_42, %c0_43, %c33] : memref<1x4x290xbf16, #tpu.memory_space<vmem>>, vector<1x4x256xbf16>
    %84 = vector.shape_cast %83 : vector<1x4x256xbf16> to vector<4x256xbf16>
    %c0_44 = arith.constant 0 : index
    %c28 = arith.constant 28 : index
    %85 = vector.load %arg2[%c0_44, %c28] : memref<8x36xbf16, #tpu.memory_space<vmem>>, vector<8x4xbf16>
    %cst_45 = arith.constant dense<0.000000e+00> : vector<8x256xf32>
    %86 = tpu.matmul %85, %84, %cst_45 {dimension_numbers = #tpu.dot_dimension_numbers<[1], [0], [0], [1], [0, 0, 1, 1], [], []>} : vector<8x4xbf16>, vector<4x256xbf16>, vector<8x256xf32> -> vector<8x256xf32>
    %87 = arith.addf %82, %86 : vector<8x256xf32>
    %c0_46 = arith.constant 0 : index
    %c0_47 = arith.constant 0 : index
    %c34 = arith.constant 34 : index
    %88 = vector.load %arg1[%c0_46, %c0_47, %c34] : memref<1x4x290xbf16, #tpu.memory_space<vmem>>, vector<1x4x256xbf16>
    %89 = vector.shape_cast %88 : vector<1x4x256xbf16> to vector<4x256xbf16>
    %c0_48 = arith.constant 0 : index
    %c32_49 = arith.constant 32 : index
    %90 = vector.load %arg2[%c0_48, %c32_49] : memref<8x36xbf16, #tpu.memory_space<vmem>>, vector<8x4xbf16>
    %cst_50 = arith.constant dense<0.000000e+00> : vector<8x256xf32>
    %91 = tpu.matmul %90, %89, %cst_50 {dimension_numbers = #tpu.dot_dimension_numbers<[1], [0], [0], [1], [0, 0, 1, 1], [], []>} : vector<8x4xbf16>, vector<4x256xbf16>, vector<8x256xf32> -> vector<8x256xf32>
    %c15_i32_51 = arith.constant 15 : i32
    %92 = vector.broadcast %c15_i32_51 : i32 to vector<1x256xi32>
    %93 = arith.cmpi slt, %16, %92 : vector<1x256xi32>
    %cst_52 = arith.constant 0.000000e+00 : f32
    %94 = vector.shape_cast %93 : vector<1x256xi1> to vector<1x256xi1>
    %95 = vector.broadcast %94 : vector<1x256xi1> to vector<8x256xi1>
    %96 = vector.broadcast %cst_52 : f32 to vector<8x256xf32>
    %97 = arith.select %95, %91, %96 : vector<8x256xi1>, vector<8x256xf32>
    %98 = arith.addf %87, %97 : vector<8x256xf32>
    %c0_53 = arith.constant 0 : index
    %c0_54 = arith.constant 0 : index
    %99 = vector.load %arg3[%c0_53, %c0_54] : memref<8x1xf32, #tpu.memory_space<vmem>>, vector<8x1xf32>
    %100 = vector.broadcast %99 : vector<8x1xf32> to vector<8x256xf32>
    %101 = arith.addf %98, %100 : vector<8x256xf32>
    %cst_55 = arith.constant 0.000000e+00 : f32
    %102 = vector.broadcast %cst_55 : f32 to vector<8x256xf32>
    %103 = arith.maximumf %101, %102 : vector<8x256xf32>
    %c0_56 = arith.constant 0 : index
    %c0_57 = arith.constant 0 : index
    %c0_58 = arith.constant 0 : index
    %104 = vector.load %arg4[%c0_56, %c0_57, %c0_58] : memref<1x8x256xf32, #tpu.memory_space<vmem>>, vector<1x8x256xf32>
    %105 = vector.shape_cast %104 : vector<1x8x256xf32> to vector<8x256xf32>
    %106 = vector.shape_cast %103 : vector<8x256xf32> to vector<1x8x256xf32>
    tpu.vector_store %arg4[%c0_56, %c0_57, %c0_58], %106 {strides = array<i32>} : memref<1x8x256xf32, #tpu.memory_space<vmem>>, vector<1x8x256xf32>,
    return
  }
  func.func @transform_0(%arg0: i32) -> (i32, i32, i32) {
    %c0_i32 = arith.constant 0 : i32
    %c0_i32_0 = arith.constant 0 : i32
    %c0_i32_1 = arith.constant 0 : i32
    return %arg0, %c0_i32, %c0_i32_0 : i32, i32, i32
  }
  func.func @transform_1(%arg0: i32) -> (i32, i32) {
    %c0_i32 = arith.constant 0 : i32
    %c0_i32_0 = arith.constant 0 : i32
    %c0_i32_1 = arith.constant 0 : i32
    return %c0_i32, %c0_i32_0 : i32, i32
  }
  func.func @transform_2(%arg0: i32) -> (i32, i32) {
    %c0_i32 = arith.constant 0 : i32
    %c0_i32_0 = arith.constant 0 : i32
    %c0_i32_1 = arith.constant 0 : i32
    return %c0_i32, %c0_i32_0 : i32, i32
  }
  func.func @transform_3(%arg0: i32) -> (i32, i32, i32) {
    %c0_i32 = arith.constant 0 : i32
    %c0_i32_0 = arith.constant 0 : i32
    %c0_i32_1 = arith.constant 0 : i32
    return %arg0, %c0_i32, %c0_i32_0 : i32, i32, i32
  }
}

</mosaic_0001>

<bundles_post_ra>
// kernel: conv_relu_forward.1
= control target key start
LH: loop header
LB: loop body
LE: loop exit
PB: predicated region body
PF: predicated region fallthrough
CT: control target
= control target key end

     0   :  { %s1159_s12 = smov 0   ;;  %s1322_s0 = inlined_call_operand.vmem [shape: bf16[2,4,290], index: 0, kind: input, shape index: {}]   ;;  %s1323_s1 = inlined_call_operand.vmem [shape: bf16[8,36], index: 1, kind: input, shape index: {}]   ;;  %s1324_s2 = inlined_call_operand.vmem [shape: f32[8,1], index: 2, kind: input, shape index: {}]   ;;  %s1325_s3 = inlined_call_operand.vmem [shape: f32[2,8,256], index: 3, kind: output, shape index: {}]  }
   0x1 LB: > { %s1035_s13 = sadd.s32 4294967295, %s1121_s12   ;;  %p1039_p0 = scmp.ge.s32.totalorder %s1121_s12, 1  ;;  %s1121_s12 = sphi %s1159_s12, %s13_s12  }
   0x2   : > { %p137_p1 = scmp.lt.s32.totalorder %s1121_s12, 3 }
   0x4   : > { %p138_p2 = pnand %p1039_p0, %p137_p1 }
   0x5   : > { %v1099_v0 = vld [vmem:[%s1323_s1] ss:$0 sps:$4 sm:$0xff] (!%p138_p2)   ;;  %v172_v1 = vlaneseq (!%p138_p2)  ;;  %p161_p3 = scmp.lt.s32.totalorder (!%p138_p2), %s1035_s13, 1  ;;  %s1123_s18 = smov (!%p138_p2), 120   ;;  %v1125_v3 = vmov (!%p138_p2), 1983009808  }
   0x6   : > { %141 = sbr.rel (%p138_p2) target bundleno = 414 (0x19e), region = 32  ;;  %v1100_v2 = vld [vmem:[%s1323_s1] ss:$0 sps:$4 sm:$0xff] (!%p138_p2)   ;;  %362 = vrot.lane.b32.xlu1 (!%p138_p2), %v1099_v0, %s1123_s18  ;;  %s1124_s19 = smov (!%p138_p2), 124   ;;  %v282_v4 = vunpack.c.l.s4 (!%p138_p2), %v1125_v3  ;;  %v1126_v6 = vmov (!%p138_p2), 0   ;;  %vm214_vm0 = vcmask (!%p138_p2), 1041408  }
   0x7   : > { %277 = vrot.lane.b32.xlu0 (!%p138_p2), %v1100_v2, %s1124_s19  ;;  %v285_v5 = vshrl.u32 (!%p138_p2), %v172_v1, 7  ;;  %253 = vmatprep.mubr.bf16.mxu0 (!%p138_p2), %v1126_v6  ;;  %s1127_s24 = smov (!%p138_p2), 126   ;;  %s1128_s25 = smov (!%p138_p2), 127   ;;  %v200_v27 = vld [vmem:[%s1323_s1] sm:$0xf] (!%p138_p2)  ;;  %vm210_vm1 = vcmask (!%p138_p2), 31744  }
   0x8   : > { %346 = vmatprep.mubr.bf16.mxu1 (!%p138_p2), %v1126_v6  ;;  %v283_v7 = vunpack.c.0.s8 (!%p138_p2), %v282_v4  ;;  %1098 = vset.pattern.permute.xlu0 (!%p138_p2), %v1126_v6  ;;  %s1129_s28 = smov (!%p138_p2), 112   ;;  %s1130_s29 = smov (!%p138_p2), 111   ;;  %v1105_v34 = vld [vmem:[%s1323_s1] ss:$0 sps:$4 sm:$0xff] (!%p138_p2)   ;;  %vm302_vm2 = vcmask (!%p138_p2), 1039360   ;;  %vm387_vm3 = vcmask (!%p138_p2), 1031168  }
   0x9   : > { %v1106_v35 = vld [vmem:[%s1323_s1] ss:$0 sps:$4 sm:$0xff] (!%p138_p2)   ;;  %s1131_s7 = smov (!%p138_p2), 116   ;;  %s1132_s8 = smov (!%p138_p2), 110   ;;  %vm480_vm4 = vcmask (!%p138_p2), 916480   ;;  %vm567_vm5 = vcmask (!%p138_p2), 908288  }
   0xa   : > { %v1185_v8 = vsub.s32 (!%p138_p2), %v283_v7, %v285_v5  ;;  %s1133_s9 = smov (!%p138_p2), 96   ;;  %v1109_v46 = vld [vmem:[%s1323_s1] ss:$0 sps:$4 sm:$0xff] (!%p138_p2)   ;;  %s1134_s16 = smov (!%p138_p2), 108   ;;  %vm652_vm6 = vcmask (!%p138_p2), 900096   ;;  %vm739_vm7 = vcmask (!%p138_p2), 785408  }
   0xb   : > { %v1110_v47 = vld [vmem:[%s1323_s1] ss:$0 sps:$4 sm:$0xff] (!%p138_p2)   ;;  %s1135_s17 = smov (!%p138_p2), 104   ;;  %s1136_s18 = smov (!%p138_p2), 95   ;;  %vm826_vm8 = vcmask (!%p138_p2), 777216   ;;  %vm911_vm9 = vcmask (!%p138_p2), 769024  }
   0xc   : > { %s1137_s19 = smov (!%p138_p2), 94   ;;  %v1113_v57 = vld [vmem:[%s1323_s1] ss:$0 sps:$4 sm:$0xff] (!%p138_p2)  }
   0xd   : > { %s1335_s13 = smov (!%p161_p3, %s1035_s13), 1  ;;  %v1114_v58 = vld [vmem:[%s1323_s1] ss:$0 sps:$4 sm:$0xff]  }
   0xe   : > { %s1073_s20 = smul.u32 6, %s1335_s13  ;;  %v968_v59 = vld [vmem:[%s1324_s2] sm:$0xff]  ;;  %s1072_s27 = sshll.u32 %s1335_s13, 4 }
   0xf   : > { %s170_s30 = scalar_lea.vmem %s1325_s3, %s1072_s27 }
  0x10   : > { %s1183_s23 = scalar_lea.vmem %s1322_s0, %s1073_s20 }
  0x11   : > { %v357_v9 = vld [vmem:[%s1183_s23] sm:$0x3f] }
  0x12   : > { %v272_v10 = vld [vmem:[%s1183_s23] sm:$0x3f]  ;;  %v372_v11 = vrot.slane %v357_v9, %v1185_v8  ;;  %v365_v16 = vcombine.high %v357_v9, %v357_v9 }
  0x13   : > { %v287_v12 = vrot.slane %v272_v10, %v1185_v8  ;;  %v280_v13 = vcombine.high %v272_v10, %v272_v10  ;;  %v450_v17 = vld [vmem:[%s1183_s23] sm:$0x3f] }
  0x14   : > { %381 = vrot.lane.b32.xlu1 %v372_v11, %s1127_s24  ;;  %v1043_v18 = vld.sshfl [vmem:[%s1183_s23] sm:$0x33 pattern:$0x76325410]  ;;  %v380_v19 = vcombine.high %v372_v11, %v372_v11  ;;  %v379_v20 = vrot.slane %v365_v16, %v1185_v8  ;;  %v465_v21 = vrot.slane %v450_v17, %v1185_v8  ;;  %v458_v25 = vcombine.high %v450_v17, %v450_v17 }
  0x15   : > { %296 = vrot.lane.b32.xlu0 %v287_v12, %s1128_s25  ;;  %v295_v14 = vcombine.high %v287_v12, %v287_v12  ;;  %v294_v15 = vrot.slane %v280_v13, %v1185_v8  ;;  %v209_v22 = vcombine.high %v1043_v18, %v1043_v18  ;;  %v216_v23 = vsel %vm214_vm0, %v1043_v18, 0  ;;  %v537_v26 = vld [vmem:[%s1183_s23] sm:$0x3f] }
  0x16   : > { %v473_v24 = vcombine.high %v465_v21, %v465_v21  ;;  %v472_v28 = vrot.slane %v458_v25, %v1185_v8  ;;  %v552_v29 = vrot.slane %v537_v26, %v1185_v8  ;;  %v545_v30 = vcombine.high %v537_v26, %v537_v26  ;;  %v622_v33 = vld [vmem:[%s1183_s23] sm:$0x3f] }
  0x17   : > { %1044 = vmatprep.subr.msk.bf16.mxu0 %vm214_vm0, %v209_v22  ;;  %v637_v36 = vrot.slane %v622_v33, %v1185_v8  ;;  %v630_v38 = vcombine.high %v622_v33, %v622_v33  ;;  %v709_v39 = vld [vmem:[%s1183_s23] sm:$0x3f] }
  0x18   : > { %300 = vrot.lane.b32.xlu1 %v294_v15, %s1128_s25  ;;  %222 = vmatpush1.bf16.msra.mxu0 %v216_v23  ;;  %v560_v31 = vcombine.high %v552_v29, %v552_v29  ;;  %v559_v32 = vrot.slane %v545_v30, %v1185_v8  ;;  %v724_v41 = vrot.slane %v709_v39, %v1185_v8  ;;  %v796_v45 = vld [vmem:[%s1183_s23] sm:$0x3f] }
  0x19   : > { %298 = vrot.lane.b32.xlu0 %v295_v14, %s1128_s25  ;;  %v645_v37 = vcombine.high %v637_v36, %v637_v36  ;;  %v644_v40 = vrot.slane %v630_v38, %v1185_v8  ;;  %v717_v42 = vcombine.high %v709_v39, %v709_v39  ;;  %v811_v48 = vrot.slane %v796_v45, %v1185_v8  ;;  %v881_v51 = vld [vmem:[%s1183_s23] sm:$0x3f] }
  0x1a   : > { %v732_v43 = vcombine.high %v724_v41, %v724_v41  ;;  %v804_v50 = vcombine.high %v796_v45, %v796_v45  ;;  %v896_v53 = vrot.slane %v881_v51, %v1185_v8  ;;  %v889_v54 = vcombine.high %v881_v51, %v881_v51 }
  0x1b   : > { %1045 = vmatmul.mubr.msk.bf16.vlgmr.msra.gmra.mrb[0].mxu0 %vm210_vm1, %v200_v27  ;;  %v731_v44 = vrot.slane %v717_v42, %v1185_v8  ;;  %v819_v49 = vcombine.high %v811_v48, %v811_v48 }
  0x1c   : > { %385 = vrot.lane.b32.xlu1 %v379_v20, %s1127_s24  ;;  %431 = vmatprep.mubr.bf16.mxu0 %v1126_v6  ;;  %v818_v52 = vrot.slane %v804_v50, %v1185_v8  ;;  %v904_v55 = vcombine.high %v896_v53, %v896_v53  ;;  %v903_v56 = vrot.slane %v889_v54, %v1185_v8 }
  0x1d   : > { %383 = vrot.lane.b32.xlu0 %v380_v19, %s1127_s24  ;;  %s1138_s24 = smov 100  }
  0x20   : > { %476 = vrot.lane.b32.xlu1 %v473_v24, %s1129_s28 }
  0x21   : > { %474 = vrot.lane.b32.xlu0 %v465_v21, %s1129_s28 }
  0x24   : > { %561 = vrot.lane.b32.xlu1 %v552_v29, %s1130_s29 }
  0x25   : > { %478 = vrot.lane.b32.xlu0 %v472_v28, %s1129_s28 }
  0x28   : > { %565 = vrot.lane.b32.xlu1 %v559_v32, %s1130_s29 }
  0x29   : > { %563 = vrot.lane.b32.xlu0 %v560_v31, %s1130_s29 }
  0x2c   : > { %542 = vrot.lane.b32.xlu1 %v1106_v35, %s1129_s28 }
  0x2d   : > { %455 = vrot.lane.b32.xlu0 %v1105_v34, %s1131_s7 }
  0x30   : > { %648 = vrot.lane.b32.xlu1 %v645_v37, %s1132_s8 }
  0x31   : > { %646 = vrot.lane.b32.xlu0 %v637_v36, %s1132_s8 }
  0x34   : > { %733 = vrot.lane.b32.xlu1 %v724_v41, %s1133_s9 }
  0x35   : > { %650 = vrot.lane.b32.xlu0 %v644_v40, %s1132_s8 }
  0x38   : > { %737 = vrot.lane.b32.xlu1 %v731_v44, %s1133_s9 }
  0x39   : > { %735 = vrot.lane.b32.xlu0 %v732_v43, %s1133_s9 }
  0x3c   : > { %714 = vrot.lane.b32.xlu1 %v1110_v47, %s1135_s17 }
  0x3d   : > { %627 = vrot.lane.b32.xlu0 %v1109_v46, %s1134_s16 }
  0x40   : > { %822 = vrot.lane.b32.xlu1 %v819_v49, %s1136_s18 }
  0x41   : > { %820 = vrot.lane.b32.xlu0 %v811_v48, %s1136_s18 }
  0x44   : > { %905 = vrot.lane.b32.xlu1 %v896_v53, %s1137_s19  ;;  %v173_v53 = vand.u32 127, %v172_v1 }
  0x45   : > { %824 = vrot.lane.b32.xlu0 %v818_v52, %s1136_s18 }
  0x46   : > { %v174_v54 = vadd.s32 128, %v173_v53 }
  0x48   : > { %909 = vrot.lane.b32.xlu1 %v903_v56, %s1137_s19  ;;  %v186_v56 = vand.u32 15, %v174_v54 }
  0x49   : > { %907 = vrot.lane.b32.xlu0 %v904_v55, %s1137_s19  ;;  %v179_v55 = vand.u32 15, %v173_v53 }
  0x4a   : > { %vm1279_vm11 = vcmp.gt.s32.totalorder %v186_v56, 0  ;;  %vm1291_vm13 = vcmp.lt.s32.totalorder %v186_v56, 15 }
  0x4b   : > { %vm1275_vm10 = vcmp.gt.s32.totalorder %v179_v55, 0  ;;  %vm1287_vm12 = vcmp.lt.s32.totalorder %v179_v55, 15 }
  0x4c   : > { %886 = vrot.lane.b32.xlu1 %v1114_v58, %s1133_s9 }
  0x4d   : > { %801 = vrot.lane.b32.xlu0 %v1113_v57, %s1138_s24 }
  0x51   : > { %971 = vperm.xlu0 %1098, %v968_v59  }
  0x78   : > { %v363_v60 = vpop.permute.xlu1 %362 }
  0x79   : > { %v278_v61 = vpop.permute.xlu0 %277 }
  0x86   : > { %v382_v62 = vpop.permute.xlu1 %381 }
  0x87   : > { %v297_v63 = vpop.permute.xlu0 %296 }
  0x8a   : > { %v301_v2 = vpop.permute.xlu1 %300 }
  0x8b   : > { %v299_v0 = vpop.permute.xlu0 %298 }
  0x8c   : > { %v304_v3 = vsel %vm302_vm2, %v299_v0, %v301_v2  ;;  %v303_v4 = vsel %vm302_vm2, %v297_v63, %v299_v0 }
  0x8d   : > { %1047 = vmatprep.subr.msk.bf16.mxu1 %vm214_vm0, %v304_v3  ;;  %v309_v5 = vsel %vm214_vm0, %v303_v4, 0 }
  0x8e   : > { %315 = vmatpush1.bf16.msra.mxu1 %v309_v5  ;;  %v386_v8 = vpop.permute.xlu1 %385 }
  0x8f   : > { %v384_v7 = vpop.permute.xlu0 %383 }
  0x90   : > { %v388_v9 = vsel %vm387_vm3, %v382_v62, %v384_v7  ;;  %v389_v10 = vsel %vm387_vm3, %v384_v7, %v386_v8 }
  0x91   : > { %v394_v11 = vsel %vm214_vm0, %v388_v9, 0  ;;  %1048 = vmatmul.mubr.msk.bf16.vlgmr.msra.gmra.mrb[0].mxu1 %vm210_vm1, %v278_v61  ;;  %1050 = vmatprep.subr.msk.bf16.mxu0 %vm214_vm0, %v389_v10 }
  0x92   : > { %400 = vmatpush1.bf16.msra.mxu0 %v394_v11  ;;  %524 = vmatprep.mubr.bf16.mxu1 %v1126_v6  ;;  %v477_v13 = vpop.permute.xlu1 %476 }
  0x93   : > { %v475_v12 = vpop.permute.xlu0 %474 }
  0x94   : > { %v481_v14 = vsel %vm480_vm4, %v475_v12, %v477_v13 }
  0x95   : > { %1051 = vmatmul.mubr.msk.bf16.vlgmr.msra.gmra.mrb[4].mxu0 %vm210_vm1, %v363_v60  ;;  %v487_v18 = vsel %vm214_vm0, %v481_v14, 0 }
  0x96   : > { %611 = vmatprep.mubr.bf16.mxu0 %v1126_v6  ;;  %v562_v16 = vpop.permute.xlu1 %561 }
  0x97   : > { %v479_v15 = vpop.permute.xlu0 %478 }
  0x98   : > { %v482_v17 = vsel %vm480_vm4, %v477_v13, %v479_v15 }
  0x99   : > { %1053 = vmatprep.subr.msk.bf16.mxu1 %vm214_vm0, %v482_v17 }
  0x9a   : > { %493 = vmatpush1.bf16.msra.mxu1 %v487_v18  ;;  %v566_v20 = vpop.permute.xlu1 %565 }
  0x9b   : > { %v564_v19 = vpop.permute.xlu0 %563 }
  0x9c   : > { %v568_v21 = vsel %vm567_vm5, %v562_v16, %v564_v19  ;;  %v569_v22 = vsel %vm567_vm5, %v564_v19, %v566_v20 }
  0x9d   : > { %v574_v23 = vsel %vm214_vm0, %v568_v21, 0  ;;  %1056 = vmatprep.subr.msk.bf16.mxu0 %vm214_vm0, %v569_v22 }
  0x9e   : > { %580 = vmatpush1.bf16.msra.mxu0 %v574_v23  ;;  %v543_v25 = vpop.permute.xlu1 %542 }
  0x9f   : > { %v456_v24 = vpop.permute.xlu0 %455 }
  0xa0   : > { %1054 = vmatmul.mubr.msk.bf16.vlgmr.msra.gmra.mrb[4].mxu1 %vm210_vm1, %v456_v24 }
  0xa1   : > { %1057 = vmatmul.mubr.msk.bf16.vlgmr.msra.gmra.mrb[8].mxu0 %vm210_vm1, %v543_v25  ;;  %696 = vmatprep.mubr.bf16.mxu1 %v1126_v6 }
  0xa2   : > { %783 = vmatprep.mubr.bf16.mxu0 %v1126_v6  ;;  %v649_v27 = vpop.permute.xlu1 %648 }
  0xa3   : > { %v647_v26 = vpop.permute.xlu0 %646 }
  0xa4   : > { %v653_v28 = vsel %vm652_vm6, %v647_v26, %v649_v27 }
  0xa5   : > { %v659_v32 = vsel %vm214_vm0, %v653_v28, 0 }
  0xa6   : > { %v734_v30 = vpop.permute.xlu1 %733 }
  0xa7   : > { %v651_v29 = vpop.permute.xlu0 %650 }
  0xa8   : > { %v654_v31 = vsel %vm652_vm6, %v649_v27, %v651_v29 }
  0xa9   : > { %1059 = vmatprep.subr.msk.bf16.mxu1 %vm214_vm0, %v654_v31 }
  0xaa   : > { %665 = vmatpush1.bf16.msra.mxu1 %v659_v32  ;;  %v738_v34 = vpop.permute.xlu1 %737 }
  0xab   : > { %v736_v33 = vpop.permute.xlu0 %735 }
  0xac   : > { %v740_v35 = vsel %vm739_vm7, %v734_v30, %v736_v33  ;;  %v741_v36 = vsel %vm739_vm7, %v736_v33, %v738_v34 }
  0xad   : > { %v746_v37 = vsel %vm214_vm0, %v740_v35, 0  ;;  %1062 = vmatprep.subr.msk.bf16.mxu0 %vm214_vm0, %v741_v36 }
  0xae   : > { %752 = vmatpush1.bf16.msra.mxu0 %v746_v37  ;;  %v715_v39 = vpop.permute.xlu1 %714 }
  0xaf   : > { %v628_v38 = vpop.permute.xlu0 %627 }
  0xb0   : > { %1060 = vmatmul.mubr.msk.bf16.vlgmr.msra.gmra.mrb[8].mxu1 %vm210_vm1, %v628_v38 }
  0xb1   : > { %1063 = vmatmul.mubr.msk.bf16.vlgmr.msra.gmra.mrb[12].mxu0 %vm210_vm1, %v715_v39  ;;  %870 = vmatprep.mubr.bf16.mxu1 %v1126_v6 }
  0xb2   : > { %955 = vmatprep.mubr.bf16.mxu0 %v1126_v6  ;;  %v823_v41 = vpop.permute.xlu1 %822 }
  0xb3   : > { %v821_v40 = vpop.permute.xlu0 %820 }
  0xb4   : > { %v827_v42 = vsel %vm826_vm8, %v821_v40, %v823_v41 }
  0xb5   : > { %v833_v46 = vsel %vm214_vm0, %v827_v42, 0 }
  0xb6   : > { %v906_v44 = vpop.permute.xlu1 %905 }
  0xb7   : > { %v825_v43 = vpop.permute.xlu0 %824 }
  0xb8   : > { %v828_v45 = vsel %vm826_vm8, %v823_v41, %v825_v43 }
  0xb9   : > { %1065 = vmatprep.subr.msk.bf16.mxu1 %vm214_vm0, %v828_v45 }
  0xba   : > { %839 = vmatpush1.bf16.msra.mxu1 %v833_v46  ;;  %v910_v48 = vpop.permute.xlu1 %909 }
  0xbb   : > { %v908_v47 = vpop.permute.xlu0 %907 }
  0xbc   : > { %v912_v49 = vsel %vm911_vm9, %v906_v44, %v908_v47  ;;  %v913_v50 = vsel %vm911_vm9, %v908_v47, %v910_v48 }
  0xbd   : > { %v918_v51 = vsel %vm214_vm0, %v912_v49, 0  ;;  %1068 = vmatprep.subr.msk.bf16.mxu0 %vm214_vm0, %v913_v50 }
  0xbe   : > { %924 = vmatpush1.bf16.msra.mxu0 %v918_v51  ;;  %v887_v52 = vpop.permute.xlu1 %886 }
  0xbf   : > { %v802_v6 = vpop.permute.xlu0 %801 }
  0xc0   : > { %1066 = vmatmul.mubr.msk.bf16.vlgmr.msra.gmra.mrb[12].mxu1 %vm210_vm1, %v802_v6 }
  0xc1   : > { %1069 = vmatmul.mubr.msk.bf16.vlgmr.msra.gmra.mrb[16].mxu0 %vm210_vm1, %v887_v52 }
  0xd0   : > { %v972_v49 = vpop.permute.xlu0 %971 }
  0xee   : > { %v255_v59 = vpop.f32.mrb[0].mxu0 }
  0xef   : > { %v268_v60 = vsel %vm1275_vm10, %v255_v59, 0.0  ;;  %v257_v61 = vpop.f32.mrb[1].mxu0 }
  0xf0   : > { %v269_v62 = vsel %vm1279_vm11, %v257_v61, 0.0  ;;  %v259_v1 = vpop.f32.mrb[2].mxu0 }
  0xf1   : > { %v260_v63 = vpop.f32.mrb[3].mxu0 }
 0x164   : > { %v348_v0 = vpop.f32.mrb[0].mxu1 }
 0x165   : > { %v355_v2 = vadd.f32 %v348_v0, %v268_v60  ;;  %v350_v3 = vpop.f32.mrb[1].mxu1 }
 0x166   : > { %v356_v4 = vadd.f32 %v350_v3, %v269_v62  ;;  %v352_v5 = vpop.f32.mrb[2].mxu1 }
 0x167   : > { %v353_v8 = vpop.f32.mrb[3].mxu1 }
 0x168   : > { %v433_v10 = vpop.f32.mrb[4].mxu0 }
 0x169   : > { %v446_v11 = vsel %vm1287_vm12, %v433_v10, 0.0  ;;  %v435_v12 = vpop.f32.mrb[5].mxu0 }
 0x16a   : > { %v448_v13 = vadd.f32 %v446_v11, %v355_v2  ;;  %v447_v14 = vsel %vm1291_vm13, %v435_v12, 0.0  ;;  %v437_v15 = vpop.f32.mrb[6].mxu0 }
 0x16b   : > { %v449_v16 = vadd.f32 %v447_v14, %v356_v4  ;;  %v438_v17 = vpop.f32.mrb[7].mxu0 }
 0x173   : > { %v526_v18 = vpop.f32.mrb[4].mxu1 }
 0x174   : > { %v533_v19 = vsel %vm1275_vm10, %v526_v18, 0.0  ;;  %v528_v20 = vpop.f32.mrb[5].mxu1  ;;  %v613_v21 = vpop.f32.mrb[8].mxu0 }
 0x175   : > { %v535_v22 = vadd.f32 %v533_v19, %v448_v13  ;;  %v534_v23 = vsel %vm1279_vm11, %v528_v20, 0.0  ;;  %v530_v24 = vpop.f32.mrb[6].mxu1  ;;  %v615_v25 = vpop.f32.mrb[9].mxu0 }
 0x176   : > { %v536_v26 = vadd.f32 %v534_v23, %v449_v16  ;;  %v531_v27 = vpop.f32.mrb[7].mxu1  ;;  %v617_v28 = vpop.f32.mrb[10].mxu0 }
 0x177   : > { %v620_v29 = vadd.f32 %v613_v21, %v535_v22  ;;  %v618_v30 = vpop.f32.mrb[11].mxu0 }
 0x178   : > { %v621_v31 = vadd.f32 %v615_v25, %v536_v26 }
 0x183   : > { %v698_v32 = vpop.f32.mrb[8].mxu1 }
 0x184   : > { %v705_v33 = vsel %vm1287_vm12, %v698_v32, 0.0  ;;  %v700_v34 = vpop.f32.mrb[9].mxu1  ;;  %v785_v35 = vpop.f32.mrb[12].mxu0 }
 0x185   : > { %v707_v36 = vadd.f32 %v705_v33, %v620_v29  ;;  %v706_v37 = vsel %vm1291_vm13, %v700_v34, 0.0  ;;  %v792_v38 = vsel %vm1275_vm10, %v785_v35, 0.0  ;;  %v702_v39 = vpop.f32.mrb[10].mxu1  ;;  %v787_v40 = vpop.f32.mrb[13].mxu0 }
 0x186   : > { %v708_v41 = vadd.f32 %v706_v37, %v621_v31  ;;  %v793_v42 = vsel %vm1279_vm11, %v787_v40, 0.0  ;;  %v703_v43 = vpop.f32.mrb[11].mxu1  ;;  %v789_v44 = vpop.f32.mrb[14].mxu0 }
 0x187   : > { %v794_v45 = vadd.f32 %v792_v38, %v707_v36  ;;  %v790_v46 = vpop.f32.mrb[15].mxu0 }
 0x188   : > { %v795_v47 = vadd.f32 %v793_v42, %v708_v41 }
 0x193   : > { %v872_v48 = vpop.f32.mrb[12].mxu1 }
 0x194   : > { %v879_v50 = vadd.f32 %v872_v48, %v794_v45  ;;  %v874_v51 = vpop.f32.mrb[13].mxu1  ;;  %v957_v6 = vpop.f32.mrb[16].mxu0 }
 0x195   : > { %v880_v52 = vadd.f32 %v874_v51, %v795_v47  ;;  %v964_v53 = vsel %vm1287_vm12, %v957_v6, 0.0  ;;  %v959_v54 = vpop.f32.mrb[17].mxu0  ;;  %v876_v55 = vpop.f32.mrb[14].mxu1 }
 0x196   : > { %v966_v56 = vadd.f32 %v964_v53, %v879_v50  ;;  %v965_v57 = vsel %vm1291_vm13, %v959_v54, 0.0  ;;  %v877_v58 = vpop.f32.mrb[15].mxu1  ;;  %v961_v59 = vpop.f32.mrb[18].mxu0 }
 0x197   : > { %v967_v60 = vadd.f32 %v965_v57, %v880_v52  ;;  %v962_v61 = vpop.f32.mrb[19].mxu0 }
 0x198   : > { %v974_v62 = vadd.f32 %v972_v49, %v966_v56 }
 0x199   : > { %v975_v1 = vadd.f32 %v972_v49, %v967_v60 }
 0x19a   : > { %v976_v63 = vmax.f32 %v974_v62, 0.0 }
 0x19b   : > { %v977_v0 = vmax.f32 %v975_v1, 0.0 }
 0x19c   : > { %978 = vst [vmem:[%s170_s30] sm:$0xff] %v976_v63 }
 0x19d   : > { %979 = vst [vmem:[%s170_s30 + $0x8] sm:$0xff] %v977_v0 }
 0x19e PF: > { %s13_s12 = sadd.s32 1, %s1121_s12  }
 0x19f   : > { %p10_p4 = scmp.ge.s32.totalorder %s13_s12, 4  }
 0x1a1   :  { %12 = sbr.rel (!%p10_p4) target bundleno = 1 (0x1), region = 62 }

</bundles_post_ra>
